<compile_context>
chip_gen: v5e
topology: v5e:2x2
jax: 0.10.0
libtpu: 0.0.40
codegen_flags: <defaults>
</compile_context>

<pallas_src>
import jax
import jax.numpy as jnp
from jax.experimental import pallas as pl
from jax.experimental.pallas import tpu as pltpu


def _sum_to_11(a):
    """Reduce a 2-D f32 array to shape (1, 1) via explicit per-axis reduces."""
    return jnp.sum(jnp.sum(a, axis=1, keepdims=True), axis=0, keepdims=True)


def _make_tv_kernel(tc, th, W, inv_h, inv_w):
    lane_aligned = (W % 128 == 0) and W > 1          # lane axis fills whole vregs
    sub_aligned = lane_aligned and (th % 8 == 0) and th > 1
    # TODO(synk): for large W that is not a multiple of 128, padding W to a
    # multiple of 128 (or a masked roll) would avoid the misaligned-slice
    # relayout in the width path; the slice fallback below is correct but
    # slower in that case.

    def kernel(x_ref, out_ref, hacc_ref, wacc_ref, carry_ref):
        ht = pl.program_id(2)

        @pl.when(ht == 0)
        def _init():
            hacc_ref[...] = jnp.zeros_like(hacc_ref)
            wacc_ref[...] = jnp.zeros_like(wacc_ref)

        # Seam rows between consecutive height tiles of the same
        # (batch, channel-tile) group.  Must run before carry_ref is
        # overwritten below.  Only safe because the height axis is the
        # innermost, sequential ("arbitrary") grid axis.
        @pl.when(ht > 0)
        def _seam():
            top = x_ref[0, :, 0:1, :].astype(jnp.float32)        # (tc, 1, W)
            d = top - carry_ref[...]
            hacc_ref[...] += _sum_to_11(jnp.sum(d * d, axis=0))

        # Stream one (th, W) channel slice at a time; accumulate raw squared
        # neighbour differences in registers and reduce once per grid step.
        w_sum = None
        w_corr = None
        h_sum = None
        h_corr = None
        for c in range(tc):
            xc = x_ref[0, c, :, :].astype(jnp.float32)            # (th, W)

            # --- width (lane axis) differences ---------------------------
            if W > 1:
                if lane_aligned:
                    d = pltpu.roll(xc, shift=1, axis=1) - xc      # XLU roll
                    sq = d * d                                    # (th, W)
                    wr = xc[:, 0:1] - xc[:, W - 1:W]              # wrap pair
                    wc = wr * wr                                  # (th, 1)
                else:
                    d = xc[:, 1:] - xc[:, :-1]                    # (th, W-1)
                    sq = d * d
                    wc = None
                w_sum = sq if w_sum is None else w_sum + sq
                if wc is not None:
                    w_corr = wc if w_corr is None else w_corr + wc

            # --- height (sublane axis) differences inside the tile -------
            if th > 1:
                if sub_aligned:
                    d = pltpu.roll(xc, shift=1, axis=0) - xc      # XLU roll
                    sq = d * d                                    # (th, W)
                    hr = xc[0:1, :] - xc[th - 1:th, :]            # wrap pair
                    hc = hr * hr                                  # (1, W)
                else:
                    d = xc[1:, :] - xc[:-1, :]                    # (th-1, W)
                    sq = d * d
                    hc = None
                h_sum = sq if h_sum is None else h_sum + sq
                if hc is not None:
                    h_corr = hc if h_corr is None else h_corr + hc

        if W > 1:
            w_tot = _sum_to_11(w_sum)
            if w_corr is not None:
                w_tot = w_tot - _sum_to_11(w_corr)
            wacc_ref[...] += w_tot
        if th > 1:
            h_tot = _sum_to_11(h_sum)
            if h_corr is not None:
                h_tot = h_tot - _sum_to_11(h_corr)
            hacc_ref[...] += h_tot

        # Carry this tile's last row (per channel) for the next height tile.
        carry_ref[...] = x_ref[0, :, th - 1:th, :].astype(jnp.float32)

        @pl.when(ht == pl.num_programs(2) - 1)
        def _finish():
            out_ref[0, 0] = hacc_ref[...] * inv_h + wacc_ref[...] * inv_w

    return kernel


def _vmem_capacity_bytes():
    try:
        cap = int(pltpu.get_tpu_info().vmem_capacity_bytes)
    except Exception:
        cap = 64 * 1024 * 1024          # conservative default (v7x per-core)
    return max(cap, 64 * 1024 * 1024)


def _est_vmem_bytes(tc, th, W, itemsize):
    x_block = 2 * tc * th * W * itemsize          # double-buffered input block
    interm = 6 * th * W * 4                       # live f32 temporaries / step
    scratch = tc * W * 4 + 2 * 8 * 128 * 4        # carry rows + (1,1) accs
    return x_block + interm + scratch + (64 << 10)


def _choose_tiles(B, C, H, W, itemsize, budget):
    """Pick (channel tile, height tile) maximizing the streamed block size
    within the VMEM budget, while keeping >= min(4, B*C) parallel grid points
    so a v7x megacore can use both TensorCores."""
    target_groups = min(4, B * C)
    tc_cap = max(1, (B * C) // target_groups)
    tc_cap = min(tc_cap, C, 64)       # 64 also bounds the unrolled channel loop

    tc_cands = [d for d in range(1, C + 1) if C % d == 0 and d <= tc_cap]
    th_cands = sorted({H} | {d for d in range(8, H, 8) if H % d == 0})

    best = None
    for tc in tc_cands:
        for th in th_cands:
            if _est_vmem_bytes(tc, th, W, itemsize) > budget:
                continue
            key = (tc * th, th, tc)
            if best is None or key > best[0]:
                best = (key, tc, th)
    if best is None:
        # Nothing fits the soft budget: smallest legal tiles; vmem_limit_bytes
        # in the wrapper is sized from the actual estimate.
        return 1, min(th_cands)
    return best[1], best[2]


def tv_loss(x, tv_loss_weight: float = 1.0, *, _tiles=None):
    """Pallas implementation of TVLoss.forward for NCHW input `x`."""
    B, C, H, W = x.shape
    itemsize = jnp.dtype(x.dtype).itemsize

    vmem_cap = _vmem_capacity_bytes()
    # ~24 MiB usable on 128 MiB parts (v5e/v6e), ~16 MiB on v7x's 64 MiB.
    budget = int(min(max(vmem_cap // 4, 12 << 20), 24 << 20))
    if _tiles is None:
        tc, th = _choose_tiles(B, C, H, W, itemsize, budget)
    else:
        tc, th = _tiles
    assert C % tc == 0 and H % th == 0 and (th == H or th % 8 == 0)
    Ct, Ht = C // tc, H // th

    est = _est_vmem_bytes(tc, th, W, itemsize)
    vmem_limit = int(min(max(2 * est, 32 << 20), int(0.9 * vmem_cap)))

    count_h = C * (H - 1) * W
    count_w = C * H * (W - 1)
    # Degenerate H==1 / W==1 inputs contribute 0 instead of dividing by zero.
    inv_h = (1.0 / count_h) if count_h > 0 else 0.0
    inv_w = (1.0 / count_w) if count_w > 0 else 0.0

    kernel = _make_tv_kernel(tc, th, W, inv_h, inv_w)

    partial = pl.pallas_call(
        kernel,
        out_shape=jax.ShapeDtypeStruct((B, Ct, 1, 1), jnp.float32),
        grid_spec=pltpu.PrefetchScalarGridSpec(
            num_scalar_prefetch=0,
            grid=(B, Ct, Ht),
            in_specs=[
                pl.BlockSpec((1, tc, th, W), lambda b, c, h: (b, c, h, 0)),
            ],
            out_specs=pl.BlockSpec((1, 1, 1, 1), lambda b, c, h: (b, c, 0, 0)),
            scratch_shapes=[
                pltpu.VMEM((1, 1), jnp.float32),       # h_tv accumulator
                pltpu.VMEM((1, 1), jnp.float32),       # w_tv accumulator
                pltpu.VMEM((tc, 1, W), jnp.float32),   # per-channel carry row
            ],
        ),
        compiler_params=pltpu.CompilerParams(
            # batch / channel-tile axes are independent (megacore-parallel on
            # v7x); height tiles carry the resident accumulators + seam row
            # and must stay the innermost sequential axis.
            dimension_semantics=("parallel", "parallel", "arbitrary"),
            vmem_limit_bytes=vmem_limit,
        ),
    )(x)

    # Per-group partials are already scaled by 1/count; finish the reduction.
    return tv_loss_weight * 2.0 * jnp.sum(partial) / B


def _reference(x, weight=1.0):
    B, C, H, W = x.shape
    h_tv = jnp.sum((x[:, :, 1:, :] - x[:, :, :-1, :]) ** 2)
    w_tv = jnp.sum((x[:, :, :, 1:] - x[:, :, :, :-1]) ** 2)
    return weight * 2.0 * (h_tv / (C * (H - 1) * W) + w_tv / (C * H * (W - 1))) / B


if __name__ == "__main__":
    key = jax.random.PRNGKey(0)
    k1, k2, k3, k4 = jax.random.split(key, 4)

    # Primary test: shape implied by the module (B, C, H, W) = (2, 4, 16, 16).
    x = jax.random.normal(k1, (2, 4, 16, 16), dtype=jnp.float32)
    out = jax.block_until_ready(tv_loss(x, tv_loss_weight=1.0))
    ref = _reference(x, 1.0)
    assert jnp.allclose(out, ref, rtol=1e-5, atol=1e-6), (out, ref)

    # Seam path: force height tiling (tc=2, th=8) so the carry/seam logic and
    # the sequential accumulator axis are exercised.
    x2 = jax.random.normal(k2, (2, 4, 32, 16), dtype=jnp.float32)
    out2 = jax.block_until_ready(tv_loss(x2, tv_loss_weight=1.0, _tiles=(2, 8)))
    ref2 = _reference(x2, 1.0)
    assert jnp.allclose(out2, ref2, rtol=1e-5, atol=1e-6), (out2, ref2)

    # Aligned roll path: W a multiple of 128 and th a multiple of 8.
    x3 = jax.random.normal(k3, (1, 2, 16, 128), dtype=jnp.float32)
    out3 = jax.block_until_ready(tv_loss(x3, tv_loss_weight=0.5))
    ref3 = _reference(x3, 0.5)
    assert jnp.allclose(out3, ref3, rtol=1e-5, atol=1e-6), (out3, ref3)

    # bf16 streaming path (cast to f32 per channel inside the kernel).
    x4 = jax.random.normal(k4, (2, 4, 16, 16), dtype=jnp.bfloat16)
    out4 = jax.block_until_ready(tv_loss(x4, tv_loss_weight=1.0))
    ref4 = _reference(x4.astype(jnp.float32), 1.0)
    assert jnp.allclose(out4, ref4, rtol=1e-4, atol=1e-5), (out4, ref4)

    print("KERNEL_OK")
</pallas_src>

<mosaic_0001>
module attributes {stable_mosaic.version = 11 : i64} {
  func.func @kernel(%arg0: i32, %arg1: i32, %arg2: i32, %arg3: memref<1x2x16x16xf32, #tpu.memory_space<vmem>>, %arg4: memref<1x1x1x1xf32, #tpu.memory_space<vmem>>, %arg5: memref<1x1xf32, #tpu.memory_space<vmem>>, %arg6: memref<1x1xf32, #tpu.memory_space<vmem>>, %arg7: memref<2x1x16xf32, #tpu.memory_space<vmem>>) attributes {dimension_semantics = [#tpu.dimension_semantics<parallel>, #tpu.dimension_semantics<parallel>, #tpu.dimension_semantics<arbitrary>], iteration_bounds = array<i64: 2, 2, 1>, scalar_prefetch = 0 : i64, scratch_operands = 3 : i64, tpu.core_type = #tpu.core_type<tc>, window_params = [{transform_indices = @transform_0, window_bounds = array<i64: 1, 2, 16, 16>}, {transform_indices = @transform_1, window_bounds = array<i64: 1, 1, 1, 1>}]} {
    %c0_i32 = arith.constant 0 : i32
    %0 = arith.cmpi eq, %arg2, %c0_i32 : i32
    %1 = arith.extui %0 : i1 to i32
    %c0_i32_0 = arith.constant 0 : i32
    %2 = arith.cmpi ne, %1, %c0_i32_0 : i32
    scf.if %2 {
      %cst_28 = arith.constant 0.000000e+00 : f32
      %48 = vector.broadcast %cst_28 : f32 to vector<1x1xf32>
      %c0_29 = arith.constant 0 : index
      %c0_30 = arith.constant 0 : index
      %49 = vector.load %arg5[%c0_29, %c0_30] : memref<1x1xf32, #tpu.memory_space<vmem>>, vector<1x1xf32>
      tpu.vector_store %arg5[%c0_29, %c0_30], %48 {strides = array<i32>} : memref<1x1xf32, #tpu.memory_space<vmem>>, vector<1x1xf32>,
      %cst_31 = arith.constant 0.000000e+00 : f32
      %50 = vector.broadcast %cst_31 : f32 to vector<1x1xf32>
      %c0_32 = arith.constant 0 : index
      %c0_33 = arith.constant 0 : index
      %51 = vector.load %arg6[%c0_32, %c0_33] : memref<1x1xf32, #tpu.memory_space<vmem>>, vector<1x1xf32>
      tpu.vector_store %arg6[%c0_32, %c0_33], %50 {strides = array<i32>} : memref<1x1xf32, #tpu.memory_space<vmem>>, vector<1x1xf32>,
    } else {
    }
    %c0_i32_1 = arith.constant 0 : i32
    %3 = arith.cmpi sgt, %arg2, %c0_i32_1 : i32
    %4 = arith.extui %3 : i1 to i32
    %c0_i32_2 = arith.constant 0 : i32
    %5 = arith.cmpi ne, %4, %c0_i32_2 : i32
    scf.if %5 {
      %c0_28 = arith.constant 0 : index
      %c0_29 = arith.constant 0 : index
      %c0_30 = arith.constant 0 : index
      %c0_31 = arith.constant 0 : index
      %48 = vector.load %arg3[%c0_28, %c0_29, %c0_30, %c0_31] : memref<1x2x16x16xf32, #tpu.memory_space<vmem>>, vector<1x2x1x16xf32>
      %49 = vector.shape_cast %48 : vector<1x2x1x16xf32> to vector<2x1x16xf32>
      %c0_32 = arith.constant 0 : index
      %c0_33 = arith.constant 0 : index
      %c0_34 = arith.constant 0 : index
      %50 = vector.load %arg7[%c0_32, %c0_33, %c0_34] : memref<2x1x16xf32, #tpu.memory_space<vmem>>, vector<2x1x16xf32>
      %51 = arith.subf %49, %50 : vector<2x1x16xf32>
      %c0_35 = arith.constant 0 : index
      %c0_36 = arith.constant 0 : index
      %52 = vector.load %arg5[%c0_35, %c0_36] : memref<1x1xf32, #tpu.memory_space<vmem>>, vector<1x1xf32>
      %53 = arith.mulf %51, %51 : vector<2x1x16xf32>
      %cst_37 = arith.constant dense<0.000000e+00> : vector<1x16xf32>
      %54 = vector.multi_reduction <add>, %53, %cst_37 [0] : vector<2x1x16xf32> to vector<1x16xf32>
      %cst_38 = arith.constant dense<0.000000e+00> : vector<1xf32>
      %55 = vector.multi_reduction <add>, %54, %cst_38 [1] : vector<1x16xf32> to vector<1xf32>
      %56 = vector.shape_cast %55 : vector<1xf32> to vector<1x1xf32>
      %cst_39 = arith.constant dense<0.000000e+00> : vector<1xf32>
      %57 = vector.multi_reduction <add>, %56, %cst_39 [0] : vector<1x1xf32> to vector<1xf32>
      %58 = vector.shape_cast %57 : vector<1xf32> to vector<1x1xf32>
      %59 = arith.addf %52, %58 : vector<1x1xf32>
      %c0_40 = arith.constant 0 : index
      %c0_41 = arith.constant 0 : index
      %60 = vector.load %arg5[%c0_40, %c0_41] : memref<1x1xf32, #tpu.memory_space<vmem>>, vector<1x1xf32>
      tpu.vector_store %arg5[%c0_40, %c0_41], %59 {strides = array<i32>} : memref<1x1xf32, #tpu.memory_space<vmem>>, vector<1x1xf32>,
    } else {
    }
    %c0 = arith.constant 0 : index
    %c0_3 = arith.constant 0 : index
    %c0_4 = arith.constant 0 : index
    %c0_5 = arith.constant 0 : index
    %6 = vector.load %arg3[%c0, %c0_3, %c0_4, %c0_5] : memref<1x2x16x16xf32, #tpu.memory_space<vmem>>, vector<1x1x16x16xf32>
    %7 = vector.shape_cast %6 : vector<1x1x16x16xf32> to vector<16x16xf32>
    %8 = vector.extract_strided_slice %7 {offsets = [0, 1], sizes = [16, 15], strides = [1, 1]} : vector<16x16xf32> to vector<16x15xf32>
    %9 = vector.extract_strided_slice %7 {offsets = [0, 0], sizes = [16, 15], strides = [1, 1]} : vector<16x16xf32> to vector<16x15xf32>
    %10 = arith.subf %8, %9 : vector<16x15xf32>
    %11 = arith.mulf %10, %10 : vector<16x15xf32>
    %12 = vector.extract_strided_slice %7 {offsets = [1, 0], sizes = [15, 16], strides = [1, 1]} : vector<16x16xf32> to vector<15x16xf32>
    %13 = vector.extract_strided_slice %7 {offsets = [0, 0], sizes = [15, 16], strides = [1, 1]} : vector<16x16xf32> to vector<15x16xf32>
    %14 = arith.subf %12, %13 : vector<15x16xf32>
    %15 = arith.mulf %14, %14 : vector<15x16xf32>
    %c0_6 = arith.constant 0 : index
    %c1 = arith.constant 1 : index
    %c0_7 = arith.constant 0 : index
    %c0_8 = arith.constant 0 : index
    %16 = vector.load %arg3[%c0_6, %c1, %c0_7, %c0_8] : memref<1x2x16x16xf32, #tpu.memory_space<vmem>>, vector<1x1x16x16xf32>
    %17 = vector.shape_cast %16 : vector<1x1x16x16xf32> to vector<16x16xf32>
    %18 = vector.extract_strided_slice %17 {offsets = [0, 1], sizes = [16, 15], strides = [1, 1]} : vector<16x16xf32> to vector<16x15xf32>
    %19 = vector.extract_strided_slice %17 {offsets = [0, 0], sizes = [16, 15], strides = [1, 1]} : vector<16x16xf32> to vector<16x15xf32>
    %20 = arith.subf %18, %19 : vector<16x15xf32>
    %21 = arith.mulf %20, %20 : vector<16x15xf32>
    %22 = arith.addf %11, %21 : vector<16x15xf32>
    %23 = vector.extract_strided_slice %17 {offsets = [1, 0], sizes = [15, 16], strides = [1, 1]} : vector<16x16xf32> to vector<15x16xf32>
    %24 = vector.extract_strided_slice %17 {offsets = [0, 0], sizes = [15, 16], strides = [1, 1]} : vector<16x16xf32> to vector<15x16xf32>
    %25 = arith.subf %23, %24 : vector<15x16xf32>
    %26 = arith.mulf %25, %25 : vector<15x16xf32>
    %27 = arith.addf %15, %26 : vector<15x16xf32>
    %cst = arith.constant dense<0.000000e+00> : vector<16xf32>
    %28 = vector.multi_reduction <add>, %22, %cst [1] : vector<16x15xf32> to vector<16xf32>
    %29 = vector.shape_cast %28 : vector<16xf32> to vector<16x1xf32>
    %cst_9 = arith.constant dense<0.000000e+00> : vector<1xf32>
    %30 = vector.multi_reduction <add>, %29, %cst_9 [0] : vector<16x1xf32> to vector<1xf32>
    %31 = vector.shape_cast %30 : vector<1xf32> to vector<1x1xf32>
    %c0_10 = arith.constant 0 : index
    %c0_11 = arith.constant 0 : index
    %32 = vector.load %arg6[%c0_10, %c0_11] : memref<1x1xf32, #tpu.memory_space<vmem>>, vector<1x1xf32>
    %33 = arith.addf %32, %31 : vector<1x1xf32>
    %c0_12 = arith.constant 0 : index
    %c0_13 = arith.constant 0 : index
    %34 = vector.load %arg6[%c0_12, %c0_13] : memref<1x1xf32, #tpu.memory_space<vmem>>, vector<1x1xf32>
    tpu.vector_store %arg6[%c0_12, %c0_13], %33 {strides = array<i32>} : memref<1x1xf32, #tpu.memory_space<vmem>>, vector<1x1xf32>,
    %cst_14 = arith.constant dense<0.000000e+00> : vector<15xf32>
    %35 = vector.multi_reduction <add>, %27, %cst_14 [1] : vector<15x16xf32> to vector<15xf32>
    %36 = vector.shape_cast %35 : vector<15xf32> to vector<15x1xf32>
    %cst_15 = arith.constant dense<0.000000e+00> : vector<1xf32>
    %37 = vector.multi_reduction <add>, %36, %cst_15 [0] : vector<15x1xf32> to vector<1xf32>
    %38 = vector.shape_cast %37 : vector<1xf32> to vector<1x1xf32>
    %c0_16 = arith.constant 0 : index
    %c0_17 = arith.constant 0 : index
    %39 = vector.load %arg5[%c0_16, %c0_17] : memref<1x1xf32, #tpu.memory_space<vmem>>, vector<1x1xf32>
    %40 = arith.addf %39, %38 : vector<1x1xf32>
    %c0_18 = arith.constant 0 : index
    %c0_19 = arith.constant 0 : index
    %41 = vector.load %arg5[%c0_18, %c0_19] : memref<1x1xf32, #tpu.memory_space<vmem>>, vector<1x1xf32>
    tpu.vector_store %arg5[%c0_18, %c0_19], %40 {strides = array<i32>} : memref<1x1xf32, #tpu.memory_space<vmem>>, vector<1x1xf32>,
    %c0_20 = arith.constant 0 : index
    %c0_21 = arith.constant 0 : index
    %c15 = arith.constant 15 : index
    %c0_22 = arith.constant 0 : index
    %42 = vector.load %arg3[%c0_20, %c0_21, %c15, %c0_22] : memref<1x2x16x16xf32, #tpu.memory_space<vmem>>, vector<1x2x1x16xf32>
    %43 = vector.shape_cast %42 : vector<1x2x1x16xf32> to vector<2x1x16xf32>
    %c0_23 = arith.constant 0 : index
    %c0_24 = arith.constant 0 : index
    %c0_25 = arith.constant 0 : index
    %44 = vector.load %arg7[%c0_23, %c0_24, %c0_25] : memref<2x1x16xf32, #tpu.memory_space<vmem>>, vector<2x1x16xf32>
    tpu.vector_store %arg7[%c0_23, %c0_24, %c0_25], %43 {strides = array<i32>} : memref<2x1x16xf32, #tpu.memory_space<vmem>>, vector<2x1x16xf32>,
    %c0_i32_26 = arith.constant 0 : i32
    %45 = arith.cmpi eq, %arg2, %c0_i32_26 : i32
    %46 = arith.extui %45 : i1 to i32
    %c0_i32_27 = arith.constant 0 : i32
    %47 = arith.cmpi ne, %46, %c0_i32_27 : i32
    scf.if %47 {
      %c0_28 = arith.constant 0 : index
      %c0_29 = arith.constant 0 : index
      %48 = vector.load %arg5[%c0_28, %c0_29] : memref<1x1xf32, #tpu.memory_space<vmem>>, vector<1x1xf32>
      %cst_30 = arith.constant 0.00104166672 : f32
      %49 = vector.broadcast %cst_30 : f32 to vector<1x1xf32>
      %50 = arith.mulf %48, %49 : vector<1x1xf32>
      %c0_31 = arith.constant 0 : index
      %c0_32 = arith.constant 0 : index
      %51 = vector.load %arg6[%c0_31, %c0_32] : memref<1x1xf32, #tpu.memory_space<vmem>>, vector<1x1xf32>
      %cst_33 = arith.constant 0.00104166672 : f32
      %52 = vector.broadcast %cst_33 : f32 to vector<1x1xf32>
      %53 = arith.mulf %51, %52 : vector<1x1xf32>
      %54 = arith.addf %50, %53 : vector<1x1xf32>
      %c0_34 = arith.constant 0 : index
      %c0_35 = arith.constant 0 : index
      %c0_36 = arith.constant 0 : index
      %c0_37 = arith.constant 0 : index
      %55 = vector.load %arg4[%c0_34, %c0_35, %c0_36, %c0_37] : memref<1x1x1x1xf32, #tpu.memory_space<vmem>>, vector<1x1x1x1xf32>
      %56 = vector.shape_cast %55 : vector<1x1x1x1xf32> to vector<1x1xf32>
      %57 = vector.shape_cast %54 : vector<1x1xf32> to vector<1x1x1x1xf32>
      tpu.vector_store %arg4[%c0_34, %c0_35, %c0_36, %c0_37], %57 {strides = array<i32>} : memref<1x1x1x1xf32, #tpu.memory_space<vmem>>, vector<1x1x1x1xf32>,
    } else {
    }
    return
  }
  func.func @transform_0(%arg0: i32, %arg1: i32, %arg2: i32) -> (i32, i32, i32, i32) {
    %c0_i32 = arith.constant 0 : i32
    %c0_i32_0 = arith.constant 0 : i32
    return %arg0, %arg1, %arg2, %c0_i32 : i32, i32, i32, i32
  }
  func.func @transform_1(%arg0: i32, %arg1: i32, %arg2: i32) -> (i32, i32, i32, i32) {
    %c0_i32 = arith.constant 0 : i32
    %c0_i32_0 = arith.constant 0 : i32
    %c0_i32_1 = arith.constant 0 : i32
    return %arg0, %arg1, %c0_i32, %c0_i32_0 : i32, i32, i32, i32
  }
}

</mosaic_0001>

<bundles_post_ra>
// kernel: tpu_custom_call.1
= control target key start
LH: loop header
LB: loop body
LE: loop exit
PB: predicated region body
PF: predicated region fallthrough
CT: control target
= control target key end

     0   :  { %6 = vsyncpa [#allocation6], 0  ;;  %s745_s0 = inlined_call_operand.hbm [shape: f32[2,4,16,16], index: 0, kind: input, shape index: {}]   ;;  %s746_s1 = inlined_call_operand.vmem [shape: f32[2,2,1,1], index: 1, kind: output, shape index: {}]  }
   0x1   :  { %8 = vsyncpa [#allocation6 + $0x1], 0  ;;  %s625_s6 = smov 0   ;;  %s627_s7 = smov 0  }
   0x2   :  { %s629_s8 = smov 0   ;;  %s631_s9 = smov 0  }
   0x3   :  { %s633_s10 = smov 0   ;;  %s635_s11 = smov 0  }
   0x4   :  { %s637_s12 = smov 0   ;;  %s639_s13 = smov 0  }
   0x5 LB: > { %s419_s14 = sadd.s32 4294967295, %s608_s13   ;;  %s29_s15 = sadd.s32 1, %s600_s11  ;;  %s608_s13 = sphi %s639_s13, %s14_s13   ;;  %s604_s12 = sphi %s637_s12, %s755_s12   ;;  %s600_s11 = sphi %s635_s11, %s754_s11   ;;  %s596_s10 = sphi %s633_s10, %s753_s10   ;;  %s592_s9 = sphi %s631_s9, %s752_s9   ;;  %s588_s8 = sphi %s629_s8, %s751_s8   ;;  %s584_s7 = sphi %s627_s7, %s750_s7   ;;  %s580_s6 = sphi %s625_s6, %s749_s6  }
   0x6   : > { %p31_p0 = scmp.ge.s32.totalorder %s29_s15, 2  ;;  %s33_s16 = sadd.s32 1, %s604_s12 }
   0x7   : > { %s44_s17 = sadd.s32 1, %s588_s8  ;;  %p51_p1 = scmp.ne.s32.totalorder %s588_s8, %s584_s7 }
   0x8   : > { %s757_s15 = smov (%p31_p0, %s29_s15), 0  ;;  %s759_s16 = smov (!%p31_p0, %s33_s16), %s604_s12 }
   0x9   : > { %s38_s18 = ssub.s32 %s600_s11, %s757_s15  ;;  %p52_p2 = scmp.eq.s32.totalorder %s608_s13, 0 }
   0xa   : > { %p35_p3 = scmp.ge.s32.totalorder %s759_s16, 2  ;;  %p57_p4 = scmp.ne.s32.totalorder %s584_s7, %s580_s6 }
   0xb   : > { %p676_p5 = por %p52_p2, %p51_p1  ;;  %p58_p6 = scmp.eq.s32.totalorder %s419_s14, 0 }
   0xc   : > { %s761_s16 = smov (%p35_p3, %s759_s16), 0  ;;  %p442_p8 = scmp.lt.s32.totalorder %s608_s13, 4 }
   0xd   : > { %p682_p7 = por %p58_p6, %p57_p4  ;;  %s37_s21 = ssub.s32 %s604_s12, %s761_s16 }
   0xe   : > { %s39_s22 = sor.u32 %s38_s18, %s37_s21  ;;  %s109_s23 = sand.u32 1, %s588_s8  }
   0xf   : > { %p42_p9 = scmp.eq.s32.totalorder %s39_s22, 0  ;;  %s423_s24 = sshll.u32 %s109_s23, 5 }
  0x10   : > { %s435_s25 = sshll.u32 %s600_s11, 2  ;;  %s426_s27 = sshll.u32 %s604_s12, 3 }
  0x11   : > { %s692_s26 = scalar_select %p42_p9, %s588_s8, %s44_s17  }
  0x12   : > { %s121_s28 = sadd.s32 %s435_s25, %s426_s27  ;;  %s113_s29 = scalar_lea.vmem [#allocation5], %s423_s24 }
  0x13   : > { %s126_s30 = sshll.u32 %s113_s29, 4  ;;  %s427_s2 = sshll.u32 %s121_s28, 3  ;;  %s127_s30 = int_to_ptr.vmem [resolvable:$true] %s126_s30 }
  0x14   : > { %s123_s5 = scalar_lea.hbm %s745_s0, %s427_s2  ;;  %p439_p10 = pnand %p442_p8, %p676_p5 }
  0x15   : > { %s124_s6 = sshll.u32 %s123_s5, 4  ;;  %p428_p11 = scmp.ge.s32.totalorder %s608_s13, 1  ;;  %s125_s6 = int_to_ptr.hbm [resolvable:$true] %s124_s6 }
  0x16   : > { %s110_s14 = scalar_lea.sflag [#allocation6], %s109_s23  ;;  %s610_s17 = smov 128  }
  0x17   : > { %s611_s18 = smov 8   ;;  %p134_p12 = scmp.lt.s32.totalorder %s608_s13, 5 }
  0x18   : > { %441 = dma.hbm_to_vmem [thread:$0]  (!%p439_p10), %s125_s6, 512, %s127_s30, %s110_s14, %s610_s17, %s610_s17, %s611_s18  }
  0x19   : > { %p135_p13 = pnand %p428_p11, %p134_p12 }
  0x1a   : > { %s140_s21 = sand.u32 (!%p135_p13), 1, %s584_s7  }
  0x1b   : > { %138 = sbr.rel (%p135_p13) target bundleno = 400 (0x190), region = 24  ;;  %s429_s22 = sshll.u32 (!%p135_p13), %s140_s21, 5 }
  0x1c   : > { %s141_s24 = scalar_lea.sflag (!%p135_p13), [#allocation6], %s140_s21  ;;  %s144_s25 = scalar_lea.vmem (!%p135_p13), [#allocation5], %s429_s22 }
  0x20   : > { %575 = dma.done.wait (%p682_p7), %s141_s24, 512  }
  0x21   : > { %577 = vsyncadd (%p682_p7), %s141_s24, 4294966784  ;;  %v431_v0 = vld [vmem:[%s144_s25 + $0x10] sm:$0xff]  ;;  %s612_s19 = smov 1   ;;  %v206_v1 = vld [vmem:[%s144_s25] sm:$0xff]  ;;  %s613_s23 = smov 127   ;;  %vm220_vm0 = vcmask 1040384  }
  0x22   : > { %235 = vrot.lane.b32.xlu1 %v431_v0, %s612_s19  ;;  %210 = vrot.lane.b32.xlu0 %v206_v1, %s612_s19  ;;  %v432_v2 = vld [vmem:[%s144_s25 + $0x18] sm:$0xff]  ;;  %v207_v3 = vld [vmem:[%s144_s25 + $0x8] sm:$0xff]  ;;  %v221_v20 = vrot.slane %v206_v1, 7  ;;  %v247_v21 = vrot.slane %v431_v0, 7  ;;  %vm284_vm1 = vcmask 130049   ;;  %vm288_vm2 = vcmask 130048  }
  0x23   : > { %v248_v18 = vrot.slane %v432_v2, 7  ;;  %v222_v19 = vrot.slane %v207_v3, 7  ;;  %vm266_vm3 = vcmask 121856   ;;  %vm179_vm4 = vcmask 0   ;;  %p168_p0 = scmp.lt.s32.totalorder %s596_s10, 1  ;;  %p170_p1 = scmp.lt.s32.totalorder %s592_s9, 1 }
  0x24   : > { %v226_v24 = vsub.f32 %v206_v1, %v221_v20  ;;  %v252_v25 = vsub.f32 %v431_v0, %v247_v21  ;;  %v614_v40 = vmov 0.0   ;;  %vm294_vm5 = vcmask 1046528  }
  0x25   : > { %v223_v22 = vsel %vm220_vm0, %v221_v20, %v222_v19  ;;  %v249_v23 = vsel %vm220_vm0, %v247_v21, %v248_v18  ;;  %180 = vst.msk [vmem:[#allocation2] sm:$0x1] %vm179_vm4, %v614_v40  ;;  %s763_s10 = smov (!%p168_p0, %s596_s10), 1  ;;  %s765_s9 = smov (!%p170_p1, %s592_s9), 1 }
  0x26   : > { %v227_v26 = vsub.f32 %v207_v3, %v223_v22  ;;  %v253_v27 = vsub.f32 %v432_v2, %v249_v23  ;;  %v228_v28 = vmul.f32 %v226_v24, %v226_v24  ;;  %v254_v29 = vmul.f32 %v252_v25, %v252_v25  ;;  %181 = vst.msk [vmem:[#allocation3] sm:$0x1] %vm179_vm4, %v614_v40  ;;  %s430_s20 = sshll.u32 %s763_s10, 1 }
  0x27   : > { %s173_s27 = sadd.s32 %s430_s20, %s765_s9 }
  0x28   : > { %v229_v30 = vmul.f32 %v227_v26, %v227_v26  ;;  %v255_v31 = vmul.f32 %v253_v27, %v253_v27  ;;  %v256_v32 = vadd.f32 %v254_v29, %v228_v28  ;;  %s174_s30 = scalar_lea.vmem %s746_s1, %s173_s27 }
  0x2a   : > { %237 = vrot.lane.b32.xlu1 %v432_v2, %s612_s19  ;;  %212 = vrot.lane.b32.xlu0 %v207_v3, %s612_s19  ;;  %v257_v33 = vadd.f32 %v255_v31, %v229_v30  ;;  %v285_v34 = vsel %vm284_vm1, %v256_v32, 0.0 }
  0x2c   : > { %v289_v35 = vsel %vm288_vm2, %v257_v33, 0.0  ;;  %v308_v53 = vld [vmem:[#allocation2] sm:$0x1] }
  0x54   : > { %286 = vadd.xlane.f32.xlu0 %v285_v34  ;;  %290 = vadd.xlane.f32.xlu1 %v289_v35 }
  0x94   : > { %v236_v4 = vpop.permute.xlu1 %235  ;;  %v211_v6 = vpop.permute.xlu0 %210 }
  0x95   : > { %v241_v5 = vsub.f32 %v431_v0, %v236_v4  ;;  %v216_v7 = vsub.f32 %v206_v1, %v211_v6  ;;  %v280_v0 = vld [vmem:[#allocation3] sm:$0x1] }
  0x97   : > { %v243_v8 = vmul.f32 %v241_v5, %v241_v5  ;;  %v218_v9 = vmul.f32 %v216_v7, %v216_v7 }
  0x99   : > { %v245_v10 = vadd.f32 %v243_v8, %v218_v9 }
  0x9b   : > { %260 = vrot.lane.b32.xlu2 %v245_v10, %s613_s23 }
  0x9c   : > { %v238_v11 = vpop.permute.xlu1 %237  ;;  %v213_v13 = vpop.permute.xlu0 %212 }
  0x9d   : > { %v242_v12 = vsub.f32 %v432_v2, %v238_v11  ;;  %v217_v14 = vsub.f32 %v207_v3, %v213_v13 }
  0x9f   : > { %v244_v15 = vmul.f32 %v242_v12, %v242_v12  ;;  %v219_v16 = vmul.f32 %v217_v14, %v217_v14 }
  0xa1   : > { %v246_v17 = vadd.f32 %v244_v15, %v219_v16 }
  0xa3   : > { %262 = vrot.lane.b32.xlu2 %v246_v17, %s613_s23 }
  0xc7   : > { %v287_v41 = vpop.xlane.xlu0 %286  ;;  %v291_v42 = vpop.xlane.xlu1 %290 }
  0xc8   : > { %v295_v43 = vrot.slane %v287_v41, 1  ;;  %v296_v44 = vrot.slane %v291_v42, 1 }
  0xca   : > { %v297_v45 = vsel %vm294_vm5, %v295_v43, %v296_v44  ;;  %v300_v46 = vsel %vm294_vm5, %v296_v44, 0.0 }
  0xcb   : > { %v301_v47 = vadd.f32 %v300_v46, %v297_v45 }
  0xcd   : > { %v302_v48 = vrot.slane %v301_v47, 4 }
  0xcf   : > { %v303_v49 = vadd.f32 %v302_v48, %v301_v47 }
  0xd1   : > { %v304_v50 = vrot.slane %v303_v49, 2 }
  0xd3   : > { %v305_v51 = vadd.f32 %v304_v50, %v303_v49 }
  0xd5   : > { %v306_v52 = vrot.slane %v305_v51, 1 }
  0xd7   : > { %v307_v54 = vadd.f32 %v306_v52, %v305_v51 }
  0xd9   : > { %v309_v55 = vadd.f32 %v308_v53, %v307_v54 }
  0xdb   : > { %310 = vst.msk [vmem:[#allocation2] sm:$0x1] %vm179_vm4, %v309_v55 }
  0xe2   : > { %v319_v3 = vld [vmem:[#allocation2] sm:$0x1] }
  0xe3   : > { %v320_v5 = vmul.f32 0.0010416667, %v319_v3 }
  0xf5   : > { %v261_v36 = vpop.permute.xlu2 %260 }
  0xf6   : > { %v267_v37 = vsel %vm266_vm3, %v261_v36, 0.0 }
  0xf7   : > { %268 = vadd.xlane.f32.xlu2 %v267_v37 }
  0xfd   : > { %v263_v38 = vpop.permute.xlu2 %262 }
  0xfe   : > { %v270_v39 = vsel %vm266_vm3, %v263_v38, 0.0 }
  0xff   : > { %271 = vadd.xlane.f32.xlu2 %v270_v39 }
 0x16a   : > { %v269_v56 = vpop.xlane.xlu2 %268 }
 0x172   : > { %v272_v57 = vpop.xlane.xlu2 %271 }
 0x173   : > { %v273_v58 = vadd.f32 %v272_v57, %v269_v56 }
 0x175   : > { %v274_v59 = vrot.slane %v273_v58, 4 }
 0x177   : > { %v275_v60 = vadd.f32 %v274_v59, %v273_v58 }
 0x179   : > { %v276_v61 = vrot.slane %v275_v60, 2 }
 0x17b   : > { %v277_v62 = vadd.f32 %v276_v61, %v275_v60 }
 0x17d   : > { %v278_v63 = vrot.slane %v277_v62, 1 }
 0x17f   : > { %v279_v1 = vadd.f32 %v278_v63, %v277_v62 }
 0x181   : > { %v281_v2 = vadd.f32 %v280_v0, %v279_v1 }
 0x183   : > { %283 = vst.msk [vmem:[#allocation3] sm:$0x1] %vm179_vm4, %v281_v2 }
 0x18a   : > { %v321_v4 = vld [vmem:[#allocation3] sm:$0x1] }
 0x18b   : > { %v322_v6 = vmul.f32 0.0010416667, %v321_v4 }
 0x18d   : > { %v323_v7 = vadd.f32 %v322_v6, %v320_v5 }
 0x18f   : > { %324 = vst.msk [vmem:[%s174_s30] sm:$0x1] %vm179_vm4, %v323_v7 }
 0x190 PF: > { %s14_s13 = sadd.s32 1, %s608_s13   ;;  %s749_s6 = smov %s584_s7 }
 0x191   : > { %p11_p2 = scmp.ge.s32.totalorder %s14_s13, 6   ;;  %s750_s7 = smov %s588_s8 }
 0x192   : > { %s751_s8 = smov %s692_s26  ;;  %s752_s9 = smov %s600_s11 }
 0x193   : > { %s753_s10 = smov %s604_s12  ;;  %s754_s11 = smov %s757_s15 }
 0x194   : > { %s755_s12 = smov %s761_s16  ;;  %13 = sbr.rel (!%p11_p2) target bundleno = 5 (0x5), region = 77 }
 0x199   :  { %350 = vsyncpa [#allocation6], 1 }
 0x19a   :  { %352 = vsyncpa [#allocation6 + $0x1], 1 }

</bundles_post_ra>
